<compile_context>
chip_gen: v7x
topology: tpu7x:2x2x1
jax: 0.10.0
libtpu: 0.0.40
codegen_flags: <defaults>
</compile_context>

<pallas_src>
import functools

import jax
import jax.numpy as jnp
from jax.experimental import pallas as pl
from jax.experimental.pallas import tpu as pltpu


def _vmem_capacity_bytes():
    try:
        return int(pltpu.get_tpu_info().vmem_capacity_bytes)
    except Exception:
        return 64 << 20          # v7x per-TensorCore physical VMEM (smallest gen)


def _spatial_tile(hw, c, itemsize, block_bytes=None):
    """Lane-aligned spatial tile (multiple of 128, <= hw), VMEM-budget aware."""
    if hw <= 128:
        return hw                # block last dim == full array dim
    if block_bytes is None:
        vmem_cap = _vmem_capacity_bytes()
        # Per grid step the pipeline holds roughly:
        #   2x x block (double-buffered) + 2x t block (int32) + 2x f32 accumulator.
        per_lane = 2 * c * itemsize + 2 * 4 + 2 * 4
        budget_lanes = (vmem_cap // 4) // per_lane          # stay in ~1/4 of VMEM
        knee_lanes = (4 << 20) // (c * itemsize)            # ~4 MiB DMA knee
        lanes = min(budget_lanes, knee_lanes)
    else:
        lanes = block_bytes // (c * itemsize)
    lanes = max(128, (lanes // 128) * 128)
    return min(lanes, (hw // 128) * 128)


def _ord_loss_kernel(x_ref, t_ref, o_ref, *, hw, thw, n_tiles, tiles_per_split,
                     has_tail, has_overhang):
    # x_ref: (1, C, thw)  ordinal probabilities p_k (f32 or bf16)
    # t_ref: (1, 1, thw)  int32 discrete target labels
    # o_ref: (1, 1, thw)  f32 lane-wise partial sums, resident across the s axis
    p = pl.program_id(0)          # spatial split (megacore helper axis)
    s = pl.program_id(2)          # spatial tile within the split
    g = p * tiles_per_split + s   # global spatial-tile index

    @pl.when(s == 0)
    def _init():
        o_ref[...] = jnp.zeros_like(o_ref)

    def accumulate(masked):
        x = x_ref[0].astype(jnp.float32)        # (C, thw); f32 math on all gens
        t = t_ref[0]                            # (1, thw) int32
        c = x.shape[0]
        k = jax.lax.broadcasted_iota(jnp.int32, (c, 1), 0)
        # target <= k -> p_k ; target > k -> 1 - p_k   (select-then-log:
        # one transcendental per element).
        sel = jnp.where(t <= k, x, 1.0 - x)
        if masked:
            # Only the globally-last tile can be partial; its valid-lane count
            # is a compile-time constant.  Padded lanes -> 1.0 so log == 0 and
            # out-of-bounds garbage never reaches log().
            n_valid = hw - (n_tiles - 1) * thw
            lane = jax.lax.broadcasted_iota(jnp.int32, (1, thw), 1)
            sel = jnp.where(lane < n_valid, sel, 1.0)
        # Pre-reduce over channels (sublane axis) before the accumulator RMW:
        # accumulator traffic shrinks from (C, thw) to (1, thw) per tile.
        o_ref[...] += jnp.sum(jnp.log(sel), axis=0, keepdims=True)[None]

    if has_tail:
        @pl.when(g == n_tiles - 1)
        def _last_partial_tile():
            accumulate(masked=True)

        @pl.when(g < n_tiles - 1)
        def _full_tiles():
            accumulate(masked=False)
    elif has_overhang:
        @pl.when(g < n_tiles)
        def _valid_tiles():
            accumulate(masked=False)
    else:
        accumulate(masked=False)


@functools.partial(jax.jit, static_argnames=("block_bytes",))
def ord_loss(ord_labels, target, *, block_bytes=None):
    """ord_labels: (N, C, H, W) probabilities in (0, 1); target: (N, 1, H, W) int."""
    N, C, H, W = ord_labels.shape
    HW = H * W
    x = ord_labels.reshape(N, C, HW)                  # keep input dtype (f32/bf16)
    t = target.reshape(N, 1, HW).astype(jnp.int32)

    thw = _spatial_tile(HW, C, x.dtype.itemsize, block_bytes)
    S = pl.cdiv(HW, thw)                              # number of spatial tiles
    # Split the spatial range across a leading "parallel" axis when the batch
    # axis alone can't balance v7x's two TensorCores (N == 1 or odd N).
    split = 2 if (N % 2 == 1 and S >= 2) else 1
    s_per = pl.cdiv(S, split)
    has_tail = (HW % thw) != 0
    has_overhang = split * s_per > S

    if has_overhang:
        def in_map(p, n, s):
            return (n, 0, jnp.minimum(p * s_per + s, S - 1))   # clamped dup read
    else:
        def in_map(p, n, s):
            return (n, 0, p * s_per + s)

    def out_map(p, n, s):
        return (p * N + n, 0, 0)

    # Scoped-VMEM limit covering double-buffered inputs + accumulator + margin.
    need = 2 * C * thw * x.dtype.itemsize + 2 * thw * 4 + 2 * thw * 4
    vmem_limit = min(int(_vmem_capacity_bytes() * 0.9),
                     max(need + (2 << 20), 32 << 20))

    partial = pl.pallas_call(
        functools.partial(_ord_loss_kernel, hw=HW, thw=thw, n_tiles=S,
                          tiles_per_split=s_per, has_tail=has_tail,
                          has_overhang=has_overhang),
        out_shape=jax.ShapeDtypeStruct((split * N, 1, thw), jnp.float32),
        grid_spec=pltpu.PrefetchScalarGridSpec(
            num_scalar_prefetch=0,
            grid=(split, N, s_per),
            in_specs=[
                pl.BlockSpec((1, C, thw), in_map),
                pl.BlockSpec((1, 1, thw), in_map),
            ],
            out_specs=pl.BlockSpec((1, 1, thw), out_map),
        ),
        compiler_params=pltpu.CompilerParams(
            dimension_semantics=("parallel", "parallel", "arbitrary"),
            vmem_limit_bytes=vmem_limit,
        ),
        cost_estimate=pl.CostEstimate(
            flops=5 * N * C * HW,
            transcendentals=N * C * HW,
            bytes_accessed=N * (C * HW * x.dtype.itemsize + HW * 4)
            + split * N * thw * 4,
        ),
    )(x, t)

    # Final collapse + normalization (exactly the PyTorch `loss /= N*H*W`).
    return jnp.sum(partial, dtype=jnp.float32) / jnp.float32(N * H * W)


def _ord_loss_ref(ord_labels, target):
    # Pure-JAX reference mirroring the PyTorch loop.
    N, C, H, W = ord_labels.shape
    total = 0.0
    for k in range(C):
        p_k = ord_labels[:, k:k + 1, :, :].astype(jnp.float32)
        total = total + jnp.sum(jnp.where(target <= k, jnp.log(p_k), 0.0)) \
                      + jnp.sum(jnp.where(target > k, jnp.log(1.0 - p_k), 0.0))
    return total / (N * H * W)


if __name__ == "__main__":
    key = jax.random.PRNGKey(0)

    cases = [
        # (N, C, H, W, block_bytes)
        (2, 4, 16, 16, None),   # HW=256: single lane-aligned tile, no mask
        (2, 4, 10, 15, None),   # HW=150: two tiles, masked partial tail tile
        (1, 5, 13, 20, None),   # N=1 -> spatial split across 2 'parallel' slots
        (1, 4, 28, 25, 4096),   # forced small tiles: split + overhang + tail
    ]
    for (N, C, H, W, bb) in cases:
        k1, k2, key = jax.random.split(key, 3)
        # ordinal probabilities p_k strictly in (0, 1)
        ord_labels = jax.random.uniform(
            k1, (N, C, H, W), dtype=jnp.float32, minval=0.05, maxval=0.95)
        # discrete SID target labels in [0, C)
        target = jax.random.randint(k2, (N, 1, H, W), 0, C, dtype=jnp.int32)

        loss = ord_loss(ord_labels, target, block_bytes=bb)
        jax.block_until_ready(loss)

        ref = _ord_loss_ref(ord_labels, target)
        assert jnp.allclose(loss, ref, rtol=1e-5, atol=1e-5), (N, C, H, W, loss, ref)

    print("KERNEL_OK")
</pallas_src>

<mosaic_0001>
module attributes {stable_mosaic.version = 11 : i64} {
  func.func @_ord_loss_kernel(%arg0: i32, %arg1: i32, %arg2: i32, %arg3: memref<1x4x256xf32, #tpu.memory_space<vmem>>, %arg4: memref<1x1x256xi32, #tpu.memory_space<vmem>>, %arg5: memref<1x1x256xf32, #tpu.memory_space<vmem>>) attributes {dimension_semantics = [#tpu.dimension_semantics<parallel>, #tpu.dimension_semantics<parallel>, #tpu.dimension_semantics<arbitrary>], iteration_bounds = array<i64: 1, 2, 1>, scalar_prefetch = 0 : i64, scratch_operands = 0 : i64, tpu.core_type = #tpu.core_type<tc>, window_params = [{transform_indices = @transform_0, window_bounds = array<i64: 1, 4, 256>}, {transform_indices = @transform_1, window_bounds = array<i64: 1, 1, 256>}, {transform_indices = @transform_2, window_bounds = array<i64: 1, 1, 256>}]} {
    %c0_i32 = arith.constant 0 : i32
    %0 = arith.cmpi eq, %arg2, %c0_i32 : i32
    %1 = arith.extui %0 : i1 to i32
    %c0_i32_0 = arith.constant 0 : i32
    %2 = arith.cmpi ne, %1, %c0_i32_0 : i32
    scf.if %2 {
      %cst_13 = arith.constant 0.000000e+00 : f32
      %21 = vector.broadcast %cst_13 : f32 to vector<1x1x256xf32>
      %c0_14 = arith.constant 0 : index
      %c0_15 = arith.constant 0 : index
      %c0_16 = arith.constant 0 : index
      %22 = vector.load %arg5[%c0_14, %c0_15, %c0_16] : memref<1x1x256xf32, #tpu.memory_space<vmem>>, vector<1x1x256xf32>
      tpu.vector_store %arg5[%c0_14, %c0_15, %c0_16], %21 {strides = array<i32>} : memref<1x1x256xf32, #tpu.memory_space<vmem>>, vector<1x1x256xf32>,
    } else {
    }
    %c0 = arith.constant 0 : index
    %c0_1 = arith.constant 0 : index
    %c0_2 = arith.constant 0 : index
    %3 = vector.load %arg3[%c0, %c0_1, %c0_2] : memref<1x4x256xf32, #tpu.memory_space<vmem>>, vector<1x4x256xf32>
    %4 = vector.shape_cast %3 : vector<1x4x256xf32> to vector<4x256xf32>
    %c0_3 = arith.constant 0 : index
    %c0_4 = arith.constant 0 : index
    %c0_5 = arith.constant 0 : index
    %5 = vector.load %arg4[%c0_3, %c0_4, %c0_5] : memref<1x1x256xi32, #tpu.memory_space<vmem>>, vector<1x1x256xi32>
    %6 = vector.shape_cast %5 : vector<1x1x256xi32> to vector<1x256xi32>
    %7 = tpu.iota {dimensions = array<i32: 0>} : vector<4x1xi32>
    %8 = vector.broadcast %6 : vector<1x256xi32> to vector<4x256xi32>
    %9 = vector.broadcast %7 : vector<4x1xi32> to vector<4x256xi32>
    %10 = arith.cmpi sle, %8, %9 : vector<4x256xi32>
    %cst = arith.constant 1.000000e+00 : f32
    %11 = vector.broadcast %cst : f32 to vector<4x256xf32>
    %12 = arith.subf %11, %4 : vector<4x256xf32>
    %13 = arith.select %10, %4, %12 : vector<4x256xi1>, vector<4x256xf32>
    %c0_6 = arith.constant 0 : index
    %c0_7 = arith.constant 0 : index
    %c0_8 = arith.constant 0 : index
    %14 = vector.load %arg5[%c0_6, %c0_7, %c0_8] : memref<1x1x256xf32, #tpu.memory_space<vmem>>, vector<1x1x256xf32>
    %15 = math.log %13 : vector<4x256xf32>
    %cst_9 = arith.constant dense<0.000000e+00> : vector<256xf32>
    %16 = vector.multi_reduction <add>, %15, %cst_9 [0] : vector<4x256xf32> to vector<256xf32>
    %17 = vector.shape_cast %16 : vector<256xf32> to vector<1x256xf32>
    %18 = vector.shape_cast %17 : vector<1x256xf32> to vector<1x1x256xf32>
    %19 = arith.addf %14, %18 : vector<1x1x256xf32>
    %c0_10 = arith.constant 0 : index
    %c0_11 = arith.constant 0 : index
    %c0_12 = arith.constant 0 : index
    %20 = vector.load %arg5[%c0_10, %c0_11, %c0_12] : memref<1x1x256xf32, #tpu.memory_space<vmem>>, vector<1x1x256xf32>
    tpu.vector_store %arg5[%c0_10, %c0_11, %c0_12], %19 {strides = array<i32>} : memref<1x1x256xf32, #tpu.memory_space<vmem>>, vector<1x1x256xf32>,
    return
  }
  func.func @transform_0(%arg0: i32, %arg1: i32, %arg2: i32) -> (i32, i32, i32) {
    %c1_i32 = arith.constant 1 : i32
    %0 = arith.muli %arg0, %c1_i32 : i32
    %1 = arith.addi %0, %arg2 : i32
    %c0_i32 = arith.constant 0 : i32
    %c0_i32_0 = arith.constant 0 : i32
    return %arg1, %c0_i32, %1 : i32, i32, i32
  }
  func.func @transform_1(%arg0: i32, %arg1: i32, %arg2: i32) -> (i32, i32, i32) {
    %c1_i32 = arith.constant 1 : i32
    %0 = arith.muli %arg0, %c1_i32 : i32
    %1 = arith.addi %0, %arg2 : i32
    %c0_i32 = arith.constant 0 : i32
    %c0_i32_0 = arith.constant 0 : i32
    return %arg1, %c0_i32, %1 : i32, i32, i32
  }
  func.func @transform_2(%arg0: i32, %arg1: i32, %arg2: i32) -> (i32, i32, i32) {
    %c2_i32 = arith.constant 2 : i32
    %0 = arith.muli %arg0, %c2_i32 : i32
    %1 = arith.addi %0, %arg1 : i32
    %c0_i32 = arith.constant 0 : i32
    %c0_i32_0 = arith.constant 0 : i32
    %c0_i32_1 = arith.constant 0 : i32
    return %1, %c0_i32, %c0_i32_0 : i32, i32, i32
  }
}

</mosaic_0001>

<bundles_post_ra>
// kernel: ord_loss.1
= control target key start
LH: loop header
LB: loop body
LE: loop exit
PB: predicated region body
PF: predicated region fallthrough
CT: control target
= control target key end

     0   :  { %s486_s9 = smov 0   ;;  %s488_s10 = smov 0   ;;  %s535_s0 = inlined_call_operand.vmem [shape: f32[2,4,256], index: 0, kind: input, shape index: {}]   ;;  %s536_s1 = inlined_call_operand.vmem [shape: s32[2,1,256], index: 1, kind: input, shape index: {}]   ;;  %s537_s2 = inlined_call_operand.vmem [shape: f32[2,1,256], index: 2, kind: output, shape index: {}]  }
   0x1   :  { %s490_s11 = smov 0  }
   0x2 LB: > { %s27_s12 = sadd.s32 1, %s463_s10  ;;  %p406_p0 = scmp.ge.s32.totalorder %s467_s11, 1  ;;  %s467_s11 = sphi %s490_s11, %s12_s11   ;;  %s463_s10 = sphi %s488_s10, %s541_s10   ;;  %s459_s9 = sphi %s486_s9, %s540_s9  }
   0x3   : > { %p29_p1 = scmp.ge.s32.totalorder %s27_s12, 2  ;;  %p166_p2 = scmp.lt.s32.totalorder %s467_s11, 3 }
   0x5   : > { %s543_s12 = smov (%p29_p1, %s27_s12), 0  ;;  %p167_p3 = pnand %p406_p0, %p166_p2 }
   0x6   : > { %p205_p4 = scmp.lt.s32.totalorder (!%p167_p3), %s459_s9, 1  ;;  %v238_v0 = vlaneseq (!%p167_p3)  ;;  %v469_v7 = vmov (!%p167_p3), 0.0   ;;  %vm271_vm3 = vcmask (!%p167_p3), 1043456   ;;  %v470_v25 = vmov (!%p167_p3), 1966171168  }
   0x7   : > { %170 = sbr.rel (%p167_p3) target bundleno = 59 (0x3b), region = 28  ;;  %v290_v26 = vunpack.c.l.s4 (!%p167_p3), %v470_v25 }
   0x8   : > { %v246_v1 = vshrl.u32 (!%p167_p3), %v238_v0, 7  ;;  %vm504_vm0 = vcmp.lt.s32.totalorder (!%p167_p3), %v238_v0, 256 }
   0x9   : > { %v291_v31 = vunpack.c.0.s8 (!%p167_p3), %v290_v26 }
   0xa   : > { %v249_v3 = vsub.s32 (!%p167_p3), 0, %v246_v1  ;;  %v253_v4 = vsub.s32 (!%p167_p3), 1, %v246_v1 }
   0xb   : > { %v294_v36 = vsub.s32 (!%p167_p3), %v291_v31, %v246_v1 }
   0xe   : > { %s545_s9 = smov (!%p205_p4, %s459_s9), 1 }
   0xf   : > { %s413_s13 = sshll.u32 %s545_s9, 3  ;;  %s409_s14 = sshll.u32 %s545_s9, 1 }
  0x10   : > { %s212_s17 = scalar_lea.vmem %s535_s0, %s413_s13  ;;  %s223_s20 = scalar_lea.vmem %s536_s1, %s409_s14 }
  0x11   : > { %s517_s23 = scalar_lea.vmem %s537_s2, %s409_s14  ;;  %v243_v5 = vld [vmem:[%s212_s17] sm:$0xff] }
  0x12   : > { %v244_v6 = vld [vmem:[%s223_s20] sm:$0x3]  ;;  %242 = vst.msk [vmem:[%s517_s23] sm:$0x3] %vm504_vm0, %v469_v7  ;;  %v257_v10 = vsub.f32 1.0, %v243_v5  ;;  %v259_v11 = vcombine.high %v243_v5, %v243_v5 }
  0x13   : > { %v250_v8 = vrot.slane %v244_v6, %v249_v3  ;;  %v254_v9 = vrot.slane %v244_v6, %v253_v4 }
  0x14   : > { %v262_v12 = vcombine.high %v257_v10, %v257_v10 }
  0x15   : > { %vm255_vm1 = vcmp.le.s32.totalorder %v250_v8, %v246_v1  ;;  %vm256_vm2 = vcmp.le.s32.totalorder %v254_v9, %v246_v1 }
  0x16   : > { %v264_v13 = vsel %vm255_vm1, %v243_v5, %v257_v10  ;;  %v265_v14 = vsel %vm256_vm2, %v259_v11, %v262_v12 }
  0x17   : > { %441 = vlog2.f32 %v264_v13 }
  0x18   : > { %443 = vlog2.f32 %v265_v14 }
  0x19   : > { %v266_v39 = vld [vmem:[%s517_s23] sm:$0x3] }
  0x21   : > { %v442_v15 = vpop.eup %441 }
  0x22   : > { %v444_v16 = vpop.eup %443  ;;  %v268_v17 = vmul.f32 0.6931472, %v442_v15 }
  0x23   : > { %v270_v18 = vmul.f32 0.6931472, %v444_v16 }
  0x24   : > { %v272_v19 = vsel %vm271_vm3, %v268_v17, 0.0 }
  0x25   : > { %v273_v20 = vrot.slane %v272_v19, 4  ;;  %v279_v21 = vsel %vm271_vm3, %v270_v18, 0.0 }
  0x26   : > { %v280_v22 = vrot.slane %v279_v21, 4 }
  0x27   : > { %v274_v23 = vadd.f32 %v273_v20, %v272_v19 }
  0x28   : > { %v281_v24 = vadd.f32 %v280_v22, %v279_v21 }
  0x29   : > { %v275_v27 = vrot.slane %v274_v23, 2 }
  0x2a   : > { %v282_v28 = vrot.slane %v281_v24, 2 }
  0x2b   : > { %v276_v29 = vadd.f32 %v275_v27, %v274_v23 }
  0x2c   : > { %v283_v30 = vadd.f32 %v282_v28, %v281_v24 }
  0x2d   : > { %v277_v32 = vrot.slane %v276_v29, 1 }
  0x2e   : > { %v284_v33 = vrot.slane %v283_v30, 1 }
  0x2f   : > { %v278_v34 = vadd.f32 %v277_v32, %v276_v29 }
  0x30   : > { %v285_v35 = vadd.f32 %v284_v33, %v283_v30 }
  0x32   : > { %v288_v37 = vcombine.low %v278_v34, %v285_v35 }
  0x34   : > { %v295_v38 = vrot.slane %v288_v37, %v294_v36 }
  0x36   : > { %v302_v40 = vrot.slane %v295_v38, %v294_v36 }
  0x38   : > { %v304_v41 = vadd.f32 %v302_v40, %v266_v39 }
  0x3a   : > { %309 = vst.msk [vmem:[%s517_s23] sm:$0x3] %vm504_vm0, %v304_v41 }
  0x3b PF: > { %s12_s11 = sadd.s32 1, %s467_s11   ;;  %s540_s9 = smov %s463_s10 }
  0x3c   : > { %p9_p5 = scmp.ge.s32.totalorder %s12_s11, 4   ;;  %s541_s10 = smov %s543_s12 }
  0x3e   :  { %11 = sbr.rel (!%p9_p5) target bundleno = 2 (0x2), region = 65 }

</bundles_post_ra>
